<compile_context>
chip_gen: v7x
topology: tpu7x:2x2x1
jax: 0.10.0
libtpu: 0.0.40
codegen_flags: <defaults>
</compile_context>

<pallas_src>
import jax
import jax.numpy as jnp
from jax import lax
from jax.experimental import pallas as pl
from jax.experimental.pallas import tpu as pltpu


def _conv1d_glu_kernel(x_ref, w_ref, b_ref, o_ref, xim_ref):
    """One batch-block per grid step, NCL (channels-on-sublanes) layout.

    x_ref:   (BB, Cin, T)        input block (also provides the residual)
    w_ref:   (2*Cout, K*Cin)     conv weights, taps folded into the contraction
    b_ref:   (2*Cout, 1)         conv bias (f32)
    o_ref:   (BB, Cout, T)       output block (T on lanes -> lane-dense stores)
    xim_ref: (K*Cin, BB*T)       VMEM scratch: im2col, batch folded onto lanes
    """
    BB, Cin, T = x_ref.shape
    two_cout, kcin = w_ref.shape
    cout = two_cout // 2
    K = kcin // Cin
    pad = (K - 1) // 2

    # im2col in the input dtype:
    #   xim[k*Cin + ic, b*T + t] = x[b, ic, t + k - pad]   (zero outside [0, T))
    # Only the halo lanes of each tap are explicitly zeroed; every other
    # column is overwritten by the tap copy.  BB and K are small static ints,
    # so these loops fully unroll.
    for b in range(BB):
        base = b * T
        xb = x_ref[b]                                     # (Cin, T)
        for k in range(K):
            s = k - pad                                   # time shift of this tap
            lo, hi = max(0, -s), T - max(0, s)            # valid output columns
            rows = slice(k * Cin, (k + 1) * Cin)
            if lo > 0:                                    # left halo -> zero
                xim_ref[rows, base:base + lo] = jnp.zeros(
                    (Cin, lo), dtype=xim_ref.dtype)
            if hi < T:                                    # right halo -> zero
                xim_ref[rows, base + hi:base + T] = jnp.zeros(
                    (Cin, T - hi), dtype=xim_ref.dtype)
            xim_ref[rows, base + lo:base + hi] = xb[:, lo + s:hi + s]

    # Single MXU matmul for the whole batch block:
    #   (2*Cout, K*Cin) @ (K*Cin, BB*T) -> f32 accumulator (+ bias broadcast).
    acc = jnp.dot(w_ref[...], xim_ref[...],
                  preferred_element_type=jnp.float32) + b_ref[...]

    # GLU: split along channels (sublanes), gate with sigmoid (EUP slot).
    gated = acc[:cout, :] * jax.nn.sigmoid(acc[cout:, :])   # (Cout, BB*T), f32

    # Residual straight from the already-resident input tile; per-b static
    # slices of the wide slab, lane-dense T-major stores.
    for b in range(BB):
        res = x_ref[b].astype(jnp.float32)
        o_ref[b] = (res + gated[:, b * T:(b + 1) * T]).astype(o_ref.dtype)


def _vmem_limit_bytes():
    """Scale the scoped-VMEM limit to the chip (conservative fallback)."""
    try:
        cap = pltpu.get_tpu_info().vmem_capacity_bytes
    except Exception:
        cap = 64 * 1024 * 1024          # assume the smallest (v7x per-TC) VMEM
    # ~3/4 of physical, capped at 96 MiB on 128 MiB parts (v5e/v6e);
    # -> 48 MiB on v7x's 64 MiB.
    return min(int(cap * 3 // 4), 96 * 1024 * 1024)


def conv1d_glu(x_ncl, weight, bias, *, kernel_size, batch_block=8):
    """Forward pass of Conv1dGLU (eval mode).

    x_ncl:  (B, Cin, T)        -- PyTorch Conv1d layout, used directly
    weight: (2*Cout, Cin, K)   -- PyTorch Conv1d weight layout
    bias:   (2*Cout,)
    Returns (B, Cout, T).  Requires Cin == Cout (residual add).
    """
    B, Cin, T = x_ncl.shape
    two_cout, w_cin, K = weight.shape
    cout = two_cout // 2
    assert K == kernel_size and K % 2 == 1
    assert w_cin == Cin
    assert Cin == cout, "residual connection requires in_channels == out_channels"

    # Batch block: largest divisor of B that is <= batch_block AND keeps the
    # grid at >= 2 steps (so v7x's two TensorCores both get work and the
    # input DMA / output writeback have something to pipeline against).
    BB = max(1, min(batch_block, B // 2 if B >= 2 else 1))
    while B % BB:
        BB -= 1

    # Tiny parameter reshapes (negligible): fold taps into the contraction
    # axis and keep the matmul operands in the input dtype (native bf16 MXU
    # path on v6e/v7x when the activations are bf16).
    #   W2[oc, k*Cin + ic] = weight[oc, ic, k]
    w2 = jnp.transpose(weight, (0, 2, 1)).reshape(two_cout, K * Cin)
    w2 = w2.astype(x_ncl.dtype)
    b2 = bias.reshape(two_cout, 1).astype(jnp.float32)

    out = pl.pallas_call(
        _conv1d_glu_kernel,
        out_shape=jax.ShapeDtypeStruct((B, cout, T), x_ncl.dtype),
        grid_spec=pltpu.PrefetchScalarGridSpec(
            num_scalar_prefetch=0,
            grid=(B // BB,),
            in_specs=[
                pl.BlockSpec((BB, Cin, T), lambda i: (i, 0, 0)),
                pl.BlockSpec((two_cout, K * Cin), lambda i: (0, 0)),
                pl.BlockSpec((two_cout, 1), lambda i: (0, 0)),
            ],
            out_specs=pl.BlockSpec((BB, cout, T), lambda i: (i, 0, 0)),
            scratch_shapes=[pltpu.VMEM((K * Cin, BB * T), x_ncl.dtype)],
        ),
        compiler_params=pltpu.CompilerParams(
            dimension_semantics=("parallel",),
            vmem_limit_bytes=_vmem_limit_bytes(),
        ),
    )(x_ncl, w2, b2)
    return out


def _reference_conv1d_glu(x_ncl, weight, bias, *, kernel_size):
    """Pure-JAX reference (matches PyTorch eval-mode forward)."""
    pad = (kernel_size - 1) // 2
    conv = lax.conv_general_dilated(
        x_ncl, weight,
        window_strides=(1,),
        padding=[(pad, pad)],
        dimension_numbers=("NCH", "OIH", "NCH"),
    ) + bias[None, :, None]
    cout = weight.shape[0] // 2
    x1 = conv[:, :cout, :]
    x2 = conv[:, cout:, :]
    return x_ncl + x1 * jax.nn.sigmoid(x2)


if __name__ == "__main__":
    key = jax.random.PRNGKey(0)

    def run_case(B, C, T, K, batch_block):
        kx, kw, kb = jax.random.split(jax.random.fold_in(key, B * 1000 + T + K), 3)
        x = jax.random.normal(kx, (B, C, T), dtype=jnp.float32)
        weight = 0.1 * jax.random.normal(kw, (2 * C, C, K), dtype=jnp.float32)
        bias = 0.1 * jax.random.normal(kb, (2 * C,), dtype=jnp.float32)

        out = conv1d_glu(x, weight, bias, kernel_size=K, batch_block=batch_block)
        out = jax.block_until_ready(out)

        ref = _reference_conv1d_glu(x, weight, bias, kernel_size=K)
        assert out.shape == (B, C, T)
        assert jnp.allclose(out, ref, atol=1e-5, rtol=1e-5), (
            f"mismatch vs reference (B={B}, C={C}, T={T}, K={K})")

    # Module config: Conv1dGLU(in_channels=8, out_channels=8, kernel_size=3, dropout=0.1)
    # -> BB=1, grid=(2,): two grid steps even at B=2 (v7x megacore / pipelining).
    run_case(B=2, C=8, T=16, K=3, batch_block=8)
    # Second config: BB=2, grid=(2,), wider kernel (K=5).
    run_case(B=4, C=8, T=32, K=5, batch_block=2)

    print("KERNEL_OK")
</pallas_src>

<mosaic_0001>
module attributes {stable_mosaic.version = 11 : i64} {
  func.func @_conv1d_glu_kernel(%arg0: i32, %arg1: memref<1x8x16xf32, #tpu.memory_space<vmem>>, %arg2: memref<16x24xf32, #tpu.memory_space<vmem>>, %arg3: memref<16x1xf32, #tpu.memory_space<vmem>>, %arg4: memref<1x8x16xf32, #tpu.memory_space<vmem>>, %arg5: memref<24x16xf32, #tpu.memory_space<vmem>>) attributes {dimension_semantics = [#tpu.dimension_semantics<parallel>], iteration_bounds = array<i64: 2>, scalar_prefetch = 0 : i64, scratch_operands = 1 : i64, tpu.core_type = #tpu.core_type<tc>, window_params = [{transform_indices = @transform_0, window_bounds = array<i64: 1, 8, 16>}, {pipeline_mode = #tpu.pipeline_mode<synchronous>, transform_indices = @transform_1, window_bounds = array<i64: 16, 24>}, {pipeline_mode = #tpu.pipeline_mode<synchronous>, transform_indices = @transform_2, window_bounds = array<i64: 16, 1>}, {transform_indices = @transform_3, window_bounds = array<i64: 1, 8, 16>}]} {
    %c0 = arith.constant 0 : index
    %c0_0 = arith.constant 0 : index
    %c0_1 = arith.constant 0 : index
    %0 = vector.load %arg1[%c0, %c0_0, %c0_1] : memref<1x8x16xf32, #tpu.memory_space<vmem>>, vector<1x8x16xf32>
    %1 = vector.shape_cast %0 : vector<1x8x16xf32> to vector<8x16xf32>
    %cst = arith.constant 0.000000e+00 : f32
    %2 = vector.broadcast %cst : f32 to vector<8x1xf32>
    %c0_2 = arith.constant 0 : index
    %c0_3 = arith.constant 0 : index
    %3 = vector.load %arg5[%c0_2, %c0_3] : memref<24x16xf32, #tpu.memory_space<vmem>>, vector<8x1xf32>
    tpu.vector_store %arg5[%c0_2, %c0_3], %2 {strides = array<i32>} : memref<24x16xf32, #tpu.memory_space<vmem>>, vector<8x1xf32>,
    %4 = vector.extract_strided_slice %1 {offsets = [0, 0], sizes = [8, 15], strides = [1, 1]} : vector<8x16xf32> to vector<8x15xf32>
    %c0_4 = arith.constant 0 : index
    %c1 = arith.constant 1 : index
    %5 = vector.load %arg5[%c0_4, %c1] : memref<24x16xf32, #tpu.memory_space<vmem>>, vector<8x15xf32>
    tpu.vector_store %arg5[%c0_4, %c1], %4 {strides = array<i32>} : memref<24x16xf32, #tpu.memory_space<vmem>>, vector<8x15xf32>,
    %c8 = arith.constant 8 : index
    %c0_5 = arith.constant 0 : index
    %6 = vector.load %arg5[%c8, %c0_5] : memref<24x16xf32, #tpu.memory_space<vmem>>, vector<8x16xf32>
    tpu.vector_store %arg5[%c8, %c0_5], %1 {strides = array<i32>} : memref<24x16xf32, #tpu.memory_space<vmem>>, vector<8x16xf32>,
    %cst_6 = arith.constant 0.000000e+00 : f32
    %7 = vector.broadcast %cst_6 : f32 to vector<8x1xf32>
    %c16 = arith.constant 16 : index
    %c15 = arith.constant 15 : index
    %8 = vector.load %arg5[%c16, %c15] : memref<24x16xf32, #tpu.memory_space<vmem>>, vector<8x1xf32>
    tpu.vector_store %arg5[%c16, %c15], %7 {strides = array<i32>} : memref<24x16xf32, #tpu.memory_space<vmem>>, vector<8x1xf32>,
    %9 = vector.extract_strided_slice %1 {offsets = [0, 1], sizes = [8, 15], strides = [1, 1]} : vector<8x16xf32> to vector<8x15xf32>
    %c16_7 = arith.constant 16 : index
    %c0_8 = arith.constant 0 : index
    %10 = vector.load %arg5[%c16_7, %c0_8] : memref<24x16xf32, #tpu.memory_space<vmem>>, vector<8x15xf32>
    tpu.vector_store %arg5[%c16_7, %c0_8], %9 {strides = array<i32>} : memref<24x16xf32, #tpu.memory_space<vmem>>, vector<8x15xf32>,
    %c0_9 = arith.constant 0 : index
    %c0_10 = arith.constant 0 : index
    %11 = vector.load %arg2[%c0_9, %c0_10] : memref<16x24xf32, #tpu.memory_space<vmem>>, vector<16x24xf32>
    %c0_11 = arith.constant 0 : index
    %c0_12 = arith.constant 0 : index
    %12 = vector.load %arg5[%c0_11, %c0_12] : memref<24x16xf32, #tpu.memory_space<vmem>>, vector<24x16xf32>
    %cst_13 = arith.constant dense<0.000000e+00> : vector<16x16xf32>
    %13 = tpu.matmul %11, %12, %cst_13 {dimension_numbers = #tpu.dot_dimension_numbers<[1], [0], [0], [1], [0, 0, 1, 1], [], []>} : vector<16x24xf32>, vector<24x16xf32>, vector<16x16xf32> -> vector<16x16xf32>
    %c0_14 = arith.constant 0 : index
    %c0_15 = arith.constant 0 : index
    %14 = vector.load %arg3[%c0_14, %c0_15] : memref<16x1xf32, #tpu.memory_space<vmem>>, vector<16x1xf32>
    %15 = vector.broadcast %14 : vector<16x1xf32> to vector<16x16xf32>
    %16 = arith.addf %13, %15 : vector<16x16xf32>
    %17 = vector.extract_strided_slice %16 {offsets = [0, 0], sizes = [8, 16], strides = [1, 1]} : vector<16x16xf32> to vector<8x16xf32>
    %18 = vector.extract_strided_slice %16 {offsets = [8, 0], sizes = [8, 16], strides = [1, 1]} : vector<16x16xf32> to vector<8x16xf32>
    %19 = arith.negf %18 : vector<8x16xf32>
    %20 = math.exp %19 : vector<8x16xf32>
    %cst_16 = arith.constant 1.000000e+00 : f32
    %21 = vector.broadcast %cst_16 : f32 to vector<8x16xf32>
    %22 = arith.addf %21, %20 : vector<8x16xf32>
    %23 = arith.divf %21, %22 : vector<8x16xf32>
    %24 = arith.mulf %17, %23 : vector<8x16xf32>
    %c0_17 = arith.constant 0 : index
    %c0_18 = arith.constant 0 : index
    %c0_19 = arith.constant 0 : index
    %25 = vector.load %arg1[%c0_17, %c0_18, %c0_19] : memref<1x8x16xf32, #tpu.memory_space<vmem>>, vector<1x8x16xf32>
    %26 = vector.shape_cast %25 : vector<1x8x16xf32> to vector<8x16xf32>
    %27 = arith.addf %26, %24 : vector<8x16xf32>
    %c0_20 = arith.constant 0 : index
    %c0_21 = arith.constant 0 : index
    %c0_22 = arith.constant 0 : index
    %28 = vector.load %arg4[%c0_20, %c0_21, %c0_22] : memref<1x8x16xf32, #tpu.memory_space<vmem>>, vector<1x8x16xf32>
    %29 = vector.shape_cast %28 : vector<1x8x16xf32> to vector<8x16xf32>
    %30 = vector.shape_cast %27 : vector<8x16xf32> to vector<1x8x16xf32>
    tpu.vector_store %arg4[%c0_20, %c0_21, %c0_22], %30 {strides = array<i32>} : memref<1x8x16xf32, #tpu.memory_space<vmem>>, vector<1x8x16xf32>,
    return
  }
  func.func @transform_0(%arg0: i32) -> (i32, i32, i32) {
    %c0_i32 = arith.constant 0 : i32
    %c0_i32_0 = arith.constant 0 : i32
    %c0_i32_1 = arith.constant 0 : i32
    return %arg0, %c0_i32, %c0_i32_0 : i32, i32, i32
  }
  func.func @transform_1(%arg0: i32) -> (i32, i32) {
    %c0_i32 = arith.constant 0 : i32
    %c0_i32_0 = arith.constant 0 : i32
    %c0_i32_1 = arith.constant 0 : i32
    return %c0_i32, %c0_i32_0 : i32, i32
  }
  func.func @transform_2(%arg0: i32) -> (i32, i32) {
    %c0_i32 = arith.constant 0 : i32
    %c0_i32_0 = arith.constant 0 : i32
    %c0_i32_1 = arith.constant 0 : i32
    return %c0_i32, %c0_i32_0 : i32, i32
  }
  func.func @transform_3(%arg0: i32) -> (i32, i32, i32) {
    %c0_i32 = arith.constant 0 : i32
    %c0_i32_0 = arith.constant 0 : i32
    %c0_i32_1 = arith.constant 0 : i32
    return %arg0, %c0_i32, %c0_i32_0 : i32, i32, i32
  }
}

</mosaic_0001>

<bundles_post_ra>
// kernel: tpu_custom_call.1
= control target key start
LH: loop header
LB: loop body
LE: loop exit
PB: predicated region body
PF: predicated region fallthrough
CT: control target
= control target key end

     0   :  { %8 = vsyncpa [#allocation4], 0  ;;  %s757_s0 = inlined_call_operand.vmem [shape: f32[2,8,16], index: 0, kind: input, shape index: {}]   ;;  %s758_s1 = inlined_call_operand.hbm [shape: f32[16,24], index: 1, kind: input, shape index: {}]   ;;  %s759_s2 = inlined_call_operand.vmem [shape: f32[16,1], index: 2, kind: input, shape index: {}]   ;;  %s760_s3 = inlined_call_operand.hbm [shape: f32[2,8,16], index: 3, kind: output, shape index: {}]  }
   0x1   :  { %9 = vsyncpa [#allocation5], 0 }
   0x2   :  { %11 = vsyncpa [#allocation5 + $0x1], 0  ;;  %s612_s12 = smov 0   ;;  %s614_s13 = smov 0  }
   0x3   :  { %s616_s14 = smov 0   ;;  %s618_s15 = smov 0  }
   0x4 LB: > { %s633_s16 = sadd.s32 4294967295, %s582_s15   ;;  %s393_s17 = sadd.s32 4294967294, %s582_s15   ;;  %s582_s15 = sphi %s618_s15, %s776_s15   ;;  %s578_s14 = sphi %s616_s14, %s775_s14   ;;  %s574_s13 = sphi %s614_s13, %s774_s13   ;;  %s570_s12 = sphi %s612_s12, %s773_s12  }
   0x5   : > { %s637_s18 = sadd.s32 1, %s582_s15   ;;  %s92_s19 = sadd.s32 1, %s578_s14 }
   0x6   : > { %s89_s20 = ssub.s32 %s582_s15, %s637_s18  ;;  %p102_p0 = scmp.ne.s32.totalorder %s578_s14, %s574_s13 }
   0x7   : > { %p90_p1 = scmp.eq.s32.totalorder %s89_s20, 0  ;;  %p103_p2 = scmp.eq.s32.totalorder %s633_s16, 1 }
   0x8   : > { %p108_p3 = scmp.ne.s32.totalorder %s574_s13, %s570_s12  ;;  %p109_p4 = scmp.eq.s32.totalorder %s393_s17, 1 }
   0x9   : > { %s648_s21 = scalar_select %p90_p1, %s578_s14, %s92_s19  }
   0xa   : > { %p650_p5 = por %p103_p2, %p102_p0  ;;  %p654_p6 = por %p109_p4, %p108_p3 }
   0xb   : > { %p394_p7 = scmp.ge.s32.totalorder %s582_s15, 1  ;;  %p116_p8 = scmp.lt.s32.totalorder %s582_s15, 3 }
   0xc   : > { %s764_s22 = scalar_select %p650_p5, 1, 0 }
   0xd   : > { %s765_s23 = scalar_select %p654_p6, 1, 0 }
   0xe   : > { %p761_p9 = scmp.eq.s32.totalorder %s633_s16, 0  ;;  %p661_p10 = pnand %p394_p7, %p116_p8 }
   0xf   : > { %s584_s25 = smov [#allocation3]   ;;  %s488_s30 = scalar_lea.hbm %s758_s1, 256 }
  0x10   : > { %s766_s24 = scalar_select %p661_p10, 1, 0 }
  0x11   : > { %s128_s26 = sshll.u32 %s584_s25, 4  ;;  %p432_p11 = pneg %p661_p10  ;;  %s129_s26 = int_to_ptr.vmem [resolvable:$true] %s128_s26 }
  0x12   : > { %p489_p13 = scmp.ne.s32.totalorder %s758_s1, %s488_s30  ;;  %p495_p3 = scmp.lt.u32.totalorder %s488_s30, %s758_s1 }
  0x13   : > { %p669_p12 = pnand %p761_p9, %p432_p11 }
  0x15   : > { %p490_p0 = pneg %p669_p12 }
  0x17   : > { %p491_p1 = pnand %p490_p0, %p489_p13 }
  0x19   : > { %p492_p2 = pneg %p491_p1 }
  0x1b   : > { %p497_p4 = pnand %p495_p3, %p492_p2 }
  0x1d   : > { %500 = shalt.err (!%p497_p4)
}
  0x1e   : > { %s501_s8 = scalar_lea.vmem %s129_s26, 256  ;;  %p509_p9 = scmp.lt.s32.totalorder %s129_s26, %s129_s26 }
  0x1f   : > { %p502_p7 = scmp.ne.s32.totalorder %s129_s26, %s501_s8  ;;  %p510_p6 = scmp.lt.s32.totalorder %s501_s8, %s501_s8 }
  0x21   : > { %p504_p8 = pnand %p502_p7, %p490_p0  ;;  %p511_p5 = por %p510_p6, %p509_p9 }
  0x23   : > { %p505_p11 = pneg %p504_p8 }
  0x25   : > { %p512_p10 = pnand %p511_p5, %p505_p11 }
  0x27   : > { %515 = shalt.err (!%p512_p10)
}
  0x28   : > { %s585_s9 = smov 128   ;;  %s586_s10 = smov 8  }
  0x29   : > { %435 = dma.hbm_to_vmem [thread:$0]  (!%p669_p12), %s758_s1, 256, %s129_s26, [#allocation4], %s585_s9, %s585_s9, %s586_s10  }
  0x2a   : > { %p768_p13 = scmp.ne.s32.totalorder %s766_s24, 0 }
  0x2b   : > { %p769_p1 = scmp.eq.s32.totalorder (!%p768_p13), %s633_s16, 0 }
  0x2c   : > { %154 = sbr.rel (%p768_p13) target bundleno = 448 (0x1c0), region = 32 }
  0x33   : > { %561 = dma.done.wait (%p769_p1), [#allocation4], 256   ;;  %p770_p0 = pmov %p769_p1 }
  0x34   : > { %p177_p5 = scmp.lt.s32.totalorder %s633_s16, 1  ;;  %vm182_vm0 = vcmask 7168   ;;  %vm192_vm1 = vcmask 130168   ;;  %v587_v0 = vmov 0.0   ;;  %vm190_vm2 = vcmask 130048   ;;  %s588_s27 = smov 1  }
  0x35   : > { %563 = vsyncadd (%p770_p0), [#allocation4], 4294967040  ;;  %183 = vst.msk [vmem:[#allocation2] sm:$0xff] %vm182_vm0, %v587_v0  ;;  %v199_v2 = vld [vmem:[#allocation3] sm:$0xff]  ;;  %vm216_vm3 = vcmask 195584   ;;  %v205_v3 = vld [vmem:[%s759_s2 + $0x8] sm:$0xff] }
  0x36   : > { %s178_s19 = scalar_select %p177_p5, %s633_s16, 1  ;;  %193 = vst.msk [vmem:[#allocation2 + $0x10] sm:$0xff] %vm192_vm1, %v587_v0  ;;  %419 = vmatprep.mubr.msk.f32.mxu0 %vm216_vm3, %v199_v2  ;;  %v590_v4 = vmov 0   ;;  %v204_v5 = vld [vmem:[%s759_s2] sm:$0xff]  ;;  %vm188_vm4 = vcmask 130056   ;;  %vm197_vm5 = vcmask 121856  }
  0x37   : > { %s589_s30 = smov 127   ;;  %482 = vset.pattern.permute.xlu1 %v590_v4  ;;  %483 = vset.pattern.permute.xlu0 %v590_v4  ;;  %v200_v12 = vld [vmem:[#allocation3 + $0x8] sm:$0xff]  ;;  %s174_s6 = sand.u32 1, %s574_s13  }
  0x38   : > { %s400_s20 = sshll.u32 %s178_s19, 3  ;;  %213 = vperm.xlu1 %482, %v205_v3   ;;  %s399_s7 = sshll.u32 %s174_s6, 3 }
  0x39   : > { %s180_s24 = scalar_lea.vmem %s757_s0, %s400_s20  ;;  %s405_s8 = sshll.u32 %s633_s16, 7 }
  0x3a   : > { %v181_v1 = vld [vmem:[%s180_s24] sm:$0xff]  ;;  %s176_s9 = scalar_lea.vmem [#allocation6], %s399_s7  ;;  %s714_s19 = scalar_lea.hbm %s760_s3, %s405_s8 }
  0x3b   : > { %185 = vrot.lane.b32.xlu0 %v181_v1, %s588_s27  ;;  %191 = vst.msk [vmem:[#allocation2 + $0x8] sm:$0xff] %vm190_vm2, %v181_v1  ;;  %s322_s10 = sshll.u32 %s176_s9, 4  ;;  %s309_s20 = scalar_lea.sflag [#allocation5], %s174_s6  ;;  %s716_s10 = int_to_ptr.vmem [resolvable:$true] %s322_s10 }
  0x3c   : > { %208 = vperm.xlu1 %482, %v204_v5   ;;  %s516_s25 = scalar_lea.vmem %s716_s10, 128  ;;  %p771_p9 = scmp.ne.s32.totalorder %s764_s22, 0 }
  0x3d   : > { %p517_p6 = scmp.ne.s32.totalorder %s716_s10, %s516_s25  ;;  %s591_s16 = smov [#allocation6]  }
  0x3e   : > { %s520_s26 = sshll.u32 %s591_s16, 4  ;;  %s521_s26 = int_to_ptr.vmem [resolvable:$false] %s520_s26 }
  0x3f   : > { %194 = vrot.lane.b32.xlu0 %v181_v1, %s589_s30  ;;  %p518_p10 = pnand %p517_p6, %p771_p9  ;;  %s522_s24 = scalar_lea.vmem %s521_s26, 256 }
  0x40   : > { %p523_p2 = scmp.lt.s32.totalorder %s716_s10, %s521_s26  ;;  %p524_p3 = scmp.lt.s32.totalorder %s522_s24, %s516_s25 }
  0x41   : > { %p519_p12 = pneg %p518_p10 }
  0x42   : > { %v202_v8 = vld [vmem:[#allocation2 + $0x8] sm:$0xff]  ;;  %p525_p4 = por %p524_p3, %p523_p2 }
  0x44   : > { %p526_p7 = pnand %p525_p4, %p519_p12 }
  0xad   : > { %v186_v6 = vpop.permute.xlu0 %185 }
  0xae   : > { %189 = vst.msk [vmem:[#allocation2] sm:$0xff] %vm188_vm4, %v186_v6 }
  0xb1   : > { %v195_v7 = vpop.permute.xlu0 %194 }
  0xb2   : > { %198 = vst.msk [vmem:[#allocation2 + $0x10] sm:$0xff] %vm197_vm5, %v195_v7 }
  0xb5   : > { %v201_v9 = vld [vmem:[#allocation2] sm:$0xff] }
  0xb6   : > { %v422_v10 = vpack.c.bf16 %v202_v8, %v201_v9 }
  0xb7   : > { %v214_v13 = vpop.permute.xlu1 %213 }
  0xb8   : > { %423 = vmatprep.subr.bf16.mxu0 %v422_v10 }
  0xb9   : > { %425 = vmatpush3.bf16.msra.mxu0 %v422_v10  ;;  %v203_v11 = vld [vmem:[#allocation2 + $0x10] sm:$0xff] }
  0xba   : > { %417 = vmatprep.subr.mxu0 %v203_v11 }
  0xbb   : > { %v209_v20 = vpop.permute.xlu1 %208 }
  0xbd   : > { %418 = vmatpush3.msra.mxu0 %v203_v11 }
  0xbe   : > { %420 = vmatmul.mubr.msk.f32.vlgmr.msra.gmra.mrb[0].mxu0 %vm216_vm3, %v200_v12 }
 0x191   : > { %v421_v14 = vpop.f32.mrb[0].mxu0 }
 0x192   : > { %v295_v15 = vadd.f32 %v421_v14, %v214_v13  ;;  %v289_v16 = vpop.f32.mrb[1].mxu0 }
 0x193   : > { %v290_v21 = vadd.f32 %v289_v16, %v209_v20 }
 0x194   : > { %v403_v17 = vmul.f32 -1.442695, %v295_v15 }
 0x196   : > { %484 = vpow2.f32 %v403_v17 }
 0x1a0   : > { %v485_v18 = vpop.eup %484 }
 0x1a1   : > { %v301_v19 = vadd.f32 1.0, %v485_v18 }
 0x1a3   : > { %486 = vrcp.f32 %v301_v19 }
 0x1ad   : > { %v487_v22 = vpop.eup %486 }
 0x1ae   : > { %v304_v23 = vmul.f32 %v487_v22, %v290_v21 }
 0x1b0   : > { %v306_v24 = vadd.f32 %v304_v23, %v181_v1 }
 0x1b2   : > { %307 = vst.msk [vmem:[%s176_s9] sm:$0xff] %vm190_vm2, %v306_v24 }
 0x1b3   : > { %529 = shalt.err (!%p526_p7)
}
 0x1b4   : > { %s530_s27 = scalar_lea.hbm %s714_s19, 128  ;;  %s534_s30 = scalar_lea.hbm %s760_s3, 256 }
 0x1b5   : > { %p531_p8 = scmp.ne.s32.totalorder %s714_s19, %s530_s27  ;;  %p535_p1 = scmp.lt.u32.totalorder %s714_s19, %s760_s3 }
 0x1b6   : > { %p536_p0 = scmp.lt.u32.totalorder %s534_s30, %s530_s27  ;;  %p538_p6 = scmp.lt.u32.totalorder %s530_s27, %s714_s19 }
 0x1b7   : > { %p532_p11 = pnand %p531_p8, %p771_p9 }
 0x1b8   : > { %p537_p5 = por %p536_p0, %p535_p1 }
 0x1b9   : > { %p533_p13 = pneg %p532_p11 }
 0x1ba   : > { %p539_p10 = por %p538_p6, %p537_p5 }
 0x1bc   : > { %p540_p12 = pnand %p539_p10, %p533_p13 }
 0x1be   : > { %543 = shalt.err (!%p540_p12)
}
 0x1bf   : > { %430 = dma.vmem_to_hbm [thread:$0]  (%p771_p9), %s716_s10, 128, %s714_s19, %s309_s20  }
 0x1c0 PF: > { %p442_p2 = scmp.ge.s32.totalorder %s582_s15, 2  ;;  %s334_s6 = sand.u32 1, %s570_s12  }
 0x1c1   : > { %p772_p3 = scmp.ne.s32.totalorder %s765_s23, 0  ;;  %s335_s7 = scalar_lea.sflag [#allocation5], %s334_s6 }
 0x1c3   : > { %p437_p4 = pnand %p442_p2, %p772_p3 }
 0x1c5   : > { %565 = dma.done.wait (!%p437_p4), %s335_s7, 128  }
 0x1c6   : > { %567 = vsyncadd (!%p437_p4), %s335_s7, 4294967168  ;;  %p14_p7 = scmp.ge.s32.totalorder %s637_s18, 4   ;;  %s773_s12 = smov %s574_s13 }
 0x1c7   : > { %s774_s13 = smov %s578_s14  ;;  %s775_s14 = smov %s648_s21 }
 0x1c8   : > { %s776_s15 = smov %s637_s18  ;;  %16 = sbr.rel (!%p14_p7) target bundleno = 4 (0x4), region = 72 }
 0x1cf   :  { %340 = vsyncpa [#allocation4], 1 }
 0x1d0   :  { %342 = vsyncpa [#allocation4 + $0x1], 1 }
 0x1d1   :  { %343 = vsyncpa [#allocation5], 1 }
 0x1d2   :  { %345 = vsyncpa [#allocation5 + $0x1], 1 }

</bundles_post_ra>
